<compile_context>
chip_gen: v7x
topology: tpu7x:2x2x1
jax: 0.10.0
libtpu: 0.0.40
codegen_flags: <defaults>
</compile_context>

<pallas_src>
import functools
import math

import jax
import jax.numpy as jnp
from jax.experimental import pallas as pl
from jax.experimental.pallas import tpu as pltpu


def mha_kernel(x_ref, wqkv_ref, bqkv_ref, wo_ref, bo_ref, out_ref, *,
               num_heads, batch, seq):
    """Fused multi-head attention for the whole (B*S, D) batch in one step.

    x_ref:    (B*S, Din)        f32 activations
    wqkv_ref: (3, H, Din, hd)   bf16 weights, [q|k|v] split per head, Q pre-scaled
    bqkv_ref: (3, H, 1, hd)     f32 biases, Q pre-scaled
    wo_ref:   (H, hd, E)        bf16 output-projection weight blocks
    bo_ref:   (1, E)            f32 output-projection bias
    out_ref:  (B*S, E)          f32
    """
    H, B, S = num_heads, batch, seq
    N, _ = x_ref.shape
    hd = wo_ref.shape[1]
    cdt = wqkv_ref.dtype                       # MXU operand dtype (bf16)

    x = x_ref[...].astype(cdt)                 # (N, Din)

    # --- Q/K/V projections: clean 2-D MXU matmuls per head (leading-dim weight
    #     indexing is free), stacked along a merged (head*batch) batch axis. ---
    def project(which):
        heads = []
        for h in range(H):                     # static unroll, H small
            y = jnp.dot(x, wqkv_ref[which, h],
                        preferred_element_type=jnp.float32)     # (N, hd) f32
            y = y + bqkv_ref[which, h]                           # (1, hd) broadcast
            heads.append(y.reshape(B, S, hd))                    # sublane-aligned split
        return jnp.concatenate(heads, axis=0)                    # (H*B, S, hd) f32

    q = project(0)        # 1/sqrt(hd) scale already folded into Q weights/bias
    k = project(1)
    v = project(2)

    # --- batched-over-(head*batch) attention; softmax math stays in f32 ------
    s = jnp.einsum('gqd,gkd->gqk', q.astype(cdt), k.astype(cdt),
                   preferred_element_type=jnp.float32)           # (H*B, S, S) f32
    s = s - jnp.max(s, axis=-1, keepdims=True)
    p = jnp.exp(s)
    attn = p * pl.reciprocal(jnp.sum(p, axis=-1, keepdims=True), approx=True)
    vals = jnp.einsum('gqk,gkd->gqd', attn.astype(cdt), v.astype(cdt),
                      preferred_element_type=jnp.float32)        # (H*B, S, hd) f32

    # --- head-blocked output projection: o = sum_h vals_h @ Wo[h] + bo -------
    acc = None
    for h in range(H):
        vh = vals[h * B:(h + 1) * B].reshape(N, hd).astype(cdt)  # (N, hd)
        c = jnp.dot(vh, wo_ref[h], preferred_element_type=jnp.float32)  # (N, E)
        acc = c if acc is None else acc + c
    out_ref[...] = (acc + bo_ref[...]).astype(out_ref.dtype)


def multihead_attention_pallas(x, params, num_heads, compute_dtype=jnp.bfloat16):
    B, S, Din = x.shape
    E = params["o_w"].shape[1]
    hd = E // num_heads
    N = B * S

    # ---- host-side repack (layout plumbing only) ----------------------------
    # torch-style packing: column c of qkv_w maps to (head = c // (3*hd),
    # which = (c % (3*hd)) // hd, j = c % hd). Split so the kernel never slices
    # activations at a 3*hd lane stride.
    wqkv = params["qkv_w"].reshape(Din, num_heads, 3, hd).transpose(2, 1, 0, 3)  # (3,H,Din,hd)
    bqkv = params["qkv_b"].reshape(num_heads, 3, hd).transpose(1, 0, 2)[:, :, None, :]  # (3,H,1,hd)
    scale = 1.0 / math.sqrt(hd)
    wqkv = wqkv.at[0].multiply(scale)          # fold attention scale into Q
    bqkv = bqkv.at[0].multiply(scale)
    wo = params["o_w"].reshape(num_heads, hd, E)                                  # (H,hd,E)
    bo = params["o_b"].reshape(1, E)

    # bf16 MXU operands (halves weight DMA); biases stay f32.
    wqkv = wqkv.astype(compute_dtype)
    wo = wo.astype(compute_dtype)

    x2d = x.reshape(N, Din)                    # whole batch in one slab

    kernel = functools.partial(mha_kernel, num_heads=num_heads, batch=B, seq=S)
    out = pl.pallas_call(
        kernel,
        out_shape=jax.ShapeDtypeStruct((N, E), x.dtype),
        grid_spec=pltpu.PrefetchScalarGridSpec(
            num_scalar_prefetch=0,
            grid=(1,),                         # single step: everything resident in VMEM
            in_specs=[
                pl.BlockSpec((N, Din), lambda i: (0, 0)),
                pl.BlockSpec(wqkv.shape, lambda i: (0, 0, 0, 0)),
                pl.BlockSpec(bqkv.shape, lambda i: (0, 0, 0, 0)),
                pl.BlockSpec(wo.shape, lambda i: (0, 0, 0)),
                pl.BlockSpec(bo.shape, lambda i: (0, 0)),
            ],
            out_specs=pl.BlockSpec((N, E), lambda i: (0, 0)),
        ),
        compiler_params=pltpu.CompilerParams(
            dimension_semantics=("arbitrary",)),
    )(x2d, wqkv, bqkv, wo, bo)
    return out.reshape(B, S, E)


# ---------------- parameter init (deterministic, xavier-uniform, torch layout) ----
def xavier_uniform(key, fan_in, fan_out, shape):
    bound = math.sqrt(6.0 / (fan_in + fan_out))
    return jax.random.uniform(key, shape, jnp.float32, -bound, bound)


def init_mha_params(key, input_dim, embed_dim, num_heads):
    k1, k2 = jax.random.split(key)
    return {
        # stored pre-transposed as (in, out) == torch weight.T
        "qkv_w": xavier_uniform(k1, input_dim, 3 * embed_dim,
                                (input_dim, 3 * embed_dim)),
        "qkv_b": jnp.zeros((3 * embed_dim,), jnp.float32),
        "o_w":   xavier_uniform(k2, embed_dim, embed_dim, (embed_dim, embed_dim)),
        "o_b":   jnp.zeros((embed_dim,), jnp.float32),
    }


# ---------------- pure-JAX f32 reference (mirrors the PyTorch forward) ------------
def mha_ref(x, p, num_heads):
    B, S, _ = x.shape
    E = p["o_w"].shape[1]
    hd = E // num_heads
    qkv = x @ p["qkv_w"] + p["qkv_b"]
    qkv = qkv.reshape(B, S, num_heads, 3 * hd).transpose(0, 2, 1, 3)
    q, k, v = qkv[..., :hd], qkv[..., hd:2 * hd], qkv[..., 2 * hd:]
    logits = jnp.einsum("bhqd,bhkd->bhqk", q, k) / math.sqrt(hd)
    attn = jax.nn.softmax(logits, axis=-1)
    vals = jnp.einsum("bhqk,bhkd->bhqd", attn, v)
    vals = vals.transpose(0, 2, 1, 3).reshape(B, S, E)
    return vals @ p["o_w"] + p["o_b"]


if __name__ == "__main__":
    input_dim = 32      # == embed_dim in this config
    embed_dim = 32
    num_heads = 4
    B, S = 2, 8

    root = jax.random.PRNGKey(0)
    k_x, k_p = jax.random.split(root)
    x = jax.random.normal(k_x, (B, S, input_dim), jnp.float32)
    params = init_mha_params(k_p, input_dim, embed_dim, num_heads)

    out = multihead_attention_pallas(x, params, num_heads)
    out = jax.block_until_ready(out)

    ref = mha_ref(x, params, num_heads)
    assert out.shape == (B, S, embed_dim)
    # tolerance covers bf16 MXU operands + approx reciprocal vs. the f32 reference
    assert jnp.allclose(out, ref, atol=2e-2, rtol=2e-2), "mismatch vs reference"

    print("KERNEL_OK")
</pallas_src>

<mosaic_0001>
module attributes {stable_mosaic.version = 11 : i64} {
  func.func @mha_kernel(%arg0: i32, %arg1: memref<16x32xf32, #tpu.memory_space<vmem>>, %arg2: memref<3x4x32x8xbf16, #tpu.memory_space<vmem>>, %arg3: memref<3x4x1x8xf32, #tpu.memory_space<vmem>>, %arg4: memref<4x8x32xbf16, #tpu.memory_space<vmem>>, %arg5: memref<1x32xf32, #tpu.memory_space<vmem>>, %arg6: memref<16x32xf32, #tpu.memory_space<vmem>>) attributes {dimension_semantics = [#tpu.dimension_semantics<arbitrary>], iteration_bounds = array<i64: 1>, scalar_prefetch = 0 : i64, scratch_operands = 0 : i64, tpu.core_type = #tpu.core_type<tc>, window_params = [{pipeline_mode = #tpu.pipeline_mode<synchronous>, transform_indices = @transform_0, window_bounds = array<i64: 16, 32>}, {pipeline_mode = #tpu.pipeline_mode<synchronous>, transform_indices = @transform_1, window_bounds = array<i64: 3, 4, 32, 8>}, {pipeline_mode = #tpu.pipeline_mode<synchronous>, transform_indices = @transform_2, window_bounds = array<i64: 3, 4, 1, 8>}, {pipeline_mode = #tpu.pipeline_mode<synchronous>, transform_indices = @transform_3, window_bounds = array<i64: 4, 8, 32>}, {pipeline_mode = #tpu.pipeline_mode<synchronous>, transform_indices = @transform_4, window_bounds = array<i64: 1, 32>}, {pipeline_mode = #tpu.pipeline_mode<synchronous>, transform_indices = @transform_5, window_bounds = array<i64: 16, 32>}]} {
    %c0 = arith.constant 0 : index
    %c0_0 = arith.constant 0 : index
    %0 = vector.load %arg1[%c0, %c0_0] : memref<16x32xf32, #tpu.memory_space<vmem>>, vector<16x32xf32>
    %1 = arith.truncf %0 : vector<16x32xf32> to vector<16x32xbf16>
    %c0_1 = arith.constant 0 : index
    %c0_2 = arith.constant 0 : index
    %c0_3 = arith.constant 0 : index
    %c0_4 = arith.constant 0 : index
    %2 = vector.load %arg2[%c0_1, %c0_2, %c0_3, %c0_4] : memref<3x4x32x8xbf16, #tpu.memory_space<vmem>>, vector<1x1x32x8xbf16>
    %3 = vector.shape_cast %2 : vector<1x1x32x8xbf16> to vector<32x8xbf16>
    %cst = arith.constant dense<0.000000e+00> : vector<16x8xf32>
    %4 = tpu.matmul %1, %3, %cst {dimension_numbers = #tpu.dot_dimension_numbers<[1], [0], [0], [1], [0, 0, 1, 1], [], []>} : vector<16x32xbf16>, vector<32x8xbf16>, vector<16x8xf32> -> vector<16x8xf32>
    %c0_5 = arith.constant 0 : index
    %c0_6 = arith.constant 0 : index
    %c0_7 = arith.constant 0 : index
    %c0_8 = arith.constant 0 : index
    %5 = vector.load %arg3[%c0_5, %c0_6, %c0_7, %c0_8] : memref<3x4x1x8xf32, #tpu.memory_space<vmem>>, vector<1x1x1x8xf32>
    %6 = vector.shape_cast %5 : vector<1x1x1x8xf32> to vector<1x8xf32>
    %7 = vector.broadcast %6 : vector<1x8xf32> to vector<16x8xf32>
    %8 = arith.addf %4, %7 : vector<16x8xf32>
    %9 = vector.shape_cast %8 : vector<16x8xf32> to vector<2x8x8xf32>
    %c0_9 = arith.constant 0 : index
    %c1 = arith.constant 1 : index
    %c0_10 = arith.constant 0 : index
    %c0_11 = arith.constant 0 : index
    %10 = vector.load %arg2[%c0_9, %c1, %c0_10, %c0_11] : memref<3x4x32x8xbf16, #tpu.memory_space<vmem>>, vector<1x1x32x8xbf16>
    %11 = vector.shape_cast %10 : vector<1x1x32x8xbf16> to vector<32x8xbf16>
    %cst_12 = arith.constant dense<0.000000e+00> : vector<16x8xf32>
    %12 = tpu.matmul %1, %11, %cst_12 {dimension_numbers = #tpu.dot_dimension_numbers<[1], [0], [0], [1], [0, 0, 1, 1], [], []>} : vector<16x32xbf16>, vector<32x8xbf16>, vector<16x8xf32> -> vector<16x8xf32>
    %c0_13 = arith.constant 0 : index
    %c1_14 = arith.constant 1 : index
    %c0_15 = arith.constant 0 : index
    %c0_16 = arith.constant 0 : index
    %13 = vector.load %arg3[%c0_13, %c1_14, %c0_15, %c0_16] : memref<3x4x1x8xf32, #tpu.memory_space<vmem>>, vector<1x1x1x8xf32>
    %14 = vector.shape_cast %13 : vector<1x1x1x8xf32> to vector<1x8xf32>
    %15 = vector.broadcast %14 : vector<1x8xf32> to vector<16x8xf32>
    %16 = arith.addf %12, %15 : vector<16x8xf32>
    %17 = vector.shape_cast %16 : vector<16x8xf32> to vector<2x8x8xf32>
    %c0_17 = arith.constant 0 : index
    %c2 = arith.constant 2 : index
    %c0_18 = arith.constant 0 : index
    %c0_19 = arith.constant 0 : index
    %18 = vector.load %arg2[%c0_17, %c2, %c0_18, %c0_19] : memref<3x4x32x8xbf16, #tpu.memory_space<vmem>>, vector<1x1x32x8xbf16>
    %19 = vector.shape_cast %18 : vector<1x1x32x8xbf16> to vector<32x8xbf16>
    %cst_20 = arith.constant dense<0.000000e+00> : vector<16x8xf32>
    %20 = tpu.matmul %1, %19, %cst_20 {dimension_numbers = #tpu.dot_dimension_numbers<[1], [0], [0], [1], [0, 0, 1, 1], [], []>} : vector<16x32xbf16>, vector<32x8xbf16>, vector<16x8xf32> -> vector<16x8xf32>
    %c0_21 = arith.constant 0 : index
    %c2_22 = arith.constant 2 : index
    %c0_23 = arith.constant 0 : index
    %c0_24 = arith.constant 0 : index
    %21 = vector.load %arg3[%c0_21, %c2_22, %c0_23, %c0_24] : memref<3x4x1x8xf32, #tpu.memory_space<vmem>>, vector<1x1x1x8xf32>
    %22 = vector.shape_cast %21 : vector<1x1x1x8xf32> to vector<1x8xf32>
    %23 = vector.broadcast %22 : vector<1x8xf32> to vector<16x8xf32>
    %24 = arith.addf %20, %23 : vector<16x8xf32>
    %25 = vector.shape_cast %24 : vector<16x8xf32> to vector<2x8x8xf32>
    %c0_25 = arith.constant 0 : index
    %c3 = arith.constant 3 : index
    %c0_26 = arith.constant 0 : index
    %c0_27 = arith.constant 0 : index
    %26 = vector.load %arg2[%c0_25, %c3, %c0_26, %c0_27] : memref<3x4x32x8xbf16, #tpu.memory_space<vmem>>, vector<1x1x32x8xbf16>
    %27 = vector.shape_cast %26 : vector<1x1x32x8xbf16> to vector<32x8xbf16>
    %cst_28 = arith.constant dense<0.000000e+00> : vector<16x8xf32>
    %28 = tpu.matmul %1, %27, %cst_28 {dimension_numbers = #tpu.dot_dimension_numbers<[1], [0], [0], [1], [0, 0, 1, 1], [], []>} : vector<16x32xbf16>, vector<32x8xbf16>, vector<16x8xf32> -> vector<16x8xf32>
    %c0_29 = arith.constant 0 : index
    %c3_30 = arith.constant 3 : index
    %c0_31 = arith.constant 0 : index
    %c0_32 = arith.constant 0 : index
    %29 = vector.load %arg3[%c0_29, %c3_30, %c0_31, %c0_32] : memref<3x4x1x8xf32, #tpu.memory_space<vmem>>, vector<1x1x1x8xf32>
    %30 = vector.shape_cast %29 : vector<1x1x1x8xf32> to vector<1x8xf32>
    %31 = vector.broadcast %30 : vector<1x8xf32> to vector<16x8xf32>
    %32 = arith.addf %28, %31 : vector<16x8xf32>
    %33 = vector.shape_cast %32 : vector<16x8xf32> to vector<2x8x8xf32>
    %34 = tpu.concatenate %9, %17, %25, %33 in 0 : vector<2x8x8xf32>, vector<2x8x8xf32>, vector<2x8x8xf32>, vector<2x8x8xf32> -> vector<8x8x8xf32>
    %c1_33 = arith.constant 1 : index
    %c0_34 = arith.constant 0 : index
    %c0_35 = arith.constant 0 : index
    %c0_36 = arith.constant 0 : index
    %35 = vector.load %arg2[%c1_33, %c0_34, %c0_35, %c0_36] : memref<3x4x32x8xbf16, #tpu.memory_space<vmem>>, vector<1x1x32x8xbf16>
    %36 = vector.shape_cast %35 : vector<1x1x32x8xbf16> to vector<32x8xbf16>
    %cst_37 = arith.constant dense<0.000000e+00> : vector<16x8xf32>
    %37 = tpu.matmul %1, %36, %cst_37 {dimension_numbers = #tpu.dot_dimension_numbers<[1], [0], [0], [1], [0, 0, 1, 1], [], []>} : vector<16x32xbf16>, vector<32x8xbf16>, vector<16x8xf32> -> vector<16x8xf32>
    %c1_38 = arith.constant 1 : index
    %c0_39 = arith.constant 0 : index
    %c0_40 = arith.constant 0 : index
    %c0_41 = arith.constant 0 : index
    %38 = vector.load %arg3[%c1_38, %c0_39, %c0_40, %c0_41] : memref<3x4x1x8xf32, #tpu.memory_space<vmem>>, vector<1x1x1x8xf32>
    %39 = vector.shape_cast %38 : vector<1x1x1x8xf32> to vector<1x8xf32>
    %40 = vector.broadcast %39 : vector<1x8xf32> to vector<16x8xf32>
    %41 = arith.addf %37, %40 : vector<16x8xf32>
    %42 = vector.shape_cast %41 : vector<16x8xf32> to vector<2x8x8xf32>
    %c1_42 = arith.constant 1 : index
    %c1_43 = arith.constant 1 : index
    %c0_44 = arith.constant 0 : index
    %c0_45 = arith.constant 0 : index
    %43 = vector.load %arg2[%c1_42, %c1_43, %c0_44, %c0_45] : memref<3x4x32x8xbf16, #tpu.memory_space<vmem>>, vector<1x1x32x8xbf16>
    %44 = vector.shape_cast %43 : vector<1x1x32x8xbf16> to vector<32x8xbf16>
    %cst_46 = arith.constant dense<0.000000e+00> : vector<16x8xf32>
    %45 = tpu.matmul %1, %44, %cst_46 {dimension_numbers = #tpu.dot_dimension_numbers<[1], [0], [0], [1], [0, 0, 1, 1], [], []>} : vector<16x32xbf16>, vector<32x8xbf16>, vector<16x8xf32> -> vector<16x8xf32>
    %c1_47 = arith.constant 1 : index
    %c1_48 = arith.constant 1 : index
    %c0_49 = arith.constant 0 : index
    %c0_50 = arith.constant 0 : index
    %46 = vector.load %arg3[%c1_47, %c1_48, %c0_49, %c0_50] : memref<3x4x1x8xf32, #tpu.memory_space<vmem>>, vector<1x1x1x8xf32>
    %47 = vector.shape_cast %46 : vector<1x1x1x8xf32> to vector<1x8xf32>
    %48 = vector.broadcast %47 : vector<1x8xf32> to vector<16x8xf32>
    %49 = arith.addf %45, %48 : vector<16x8xf32>
    %50 = vector.shape_cast %49 : vector<16x8xf32> to vector<2x8x8xf32>
    %c1_51 = arith.constant 1 : index
    %c2_52 = arith.constant 2 : index
    %c0_53 = arith.constant 0 : index
    %c0_54 = arith.constant 0 : index
    %51 = vector.load %arg2[%c1_51, %c2_52, %c0_53, %c0_54] : memref<3x4x32x8xbf16, #tpu.memory_space<vmem>>, vector<1x1x32x8xbf16>
    %52 = vector.shape_cast %51 : vector<1x1x32x8xbf16> to vector<32x8xbf16>
    %cst_55 = arith.constant dense<0.000000e+00> : vector<16x8xf32>
    %53 = tpu.matmul %1, %52, %cst_55 {dimension_numbers = #tpu.dot_dimension_numbers<[1], [0], [0], [1], [0, 0, 1, 1], [], []>} : vector<16x32xbf16>, vector<32x8xbf16>, vector<16x8xf32> -> vector<16x8xf32>
    %c1_56 = arith.constant 1 : index
    %c2_57 = arith.constant 2 : index
    %c0_58 = arith.constant 0 : index
    %c0_59 = arith.constant 0 : index
    %54 = vector.load %arg3[%c1_56, %c2_57, %c0_58, %c0_59] : memref<3x4x1x8xf32, #tpu.memory_space<vmem>>, vector<1x1x1x8xf32>
    %55 = vector.shape_cast %54 : vector<1x1x1x8xf32> to vector<1x8xf32>
    %56 = vector.broadcast %55 : vector<1x8xf32> to vector<16x8xf32>
    %57 = arith.addf %53, %56 : vector<16x8xf32>
    %58 = vector.shape_cast %57 : vector<16x8xf32> to vector<2x8x8xf32>
    %c1_60 = arith.constant 1 : index
    %c3_61 = arith.constant 3 : index
    %c0_62 = arith.constant 0 : index
    %c0_63 = arith.constant 0 : index
    %59 = vector.load %arg2[%c1_60, %c3_61, %c0_62, %c0_63] : memref<3x4x32x8xbf16, #tpu.memory_space<vmem>>, vector<1x1x32x8xbf16>
    %60 = vector.shape_cast %59 : vector<1x1x32x8xbf16> to vector<32x8xbf16>
    %cst_64 = arith.constant dense<0.000000e+00> : vector<16x8xf32>
    %61 = tpu.matmul %1, %60, %cst_64 {dimension_numbers = #tpu.dot_dimension_numbers<[1], [0], [0], [1], [0, 0, 1, 1], [], []>} : vector<16x32xbf16>, vector<32x8xbf16>, vector<16x8xf32> -> vector<16x8xf32>
    %c1_65 = arith.constant 1 : index
    %c3_66 = arith.constant 3 : index
    %c0_67 = arith.constant 0 : index
    %c0_68 = arith.constant 0 : index
    %62 = vector.load %arg3[%c1_65, %c3_66, %c0_67, %c0_68] : memref<3x4x1x8xf32, #tpu.memory_space<vmem>>, vector<1x1x1x8xf32>
    %63 = vector.shape_cast %62 : vector<1x1x1x8xf32> to vector<1x8xf32>
    %64 = vector.broadcast %63 : vector<1x8xf32> to vector<16x8xf32>
    %65 = arith.addf %61, %64 : vector<16x8xf32>
    %66 = vector.shape_cast %65 : vector<16x8xf32> to vector<2x8x8xf32>
    %67 = tpu.concatenate %42, %50, %58, %66 in 0 : vector<2x8x8xf32>, vector<2x8x8xf32>, vector<2x8x8xf32>, vector<2x8x8xf32> -> vector<8x8x8xf32>
    %c2_69 = arith.constant 2 : index
    %c0_70 = arith.constant 0 : index
    %c0_71 = arith.constant 0 : index
    %c0_72 = arith.constant 0 : index
    %68 = vector.load %arg2[%c2_69, %c0_70, %c0_71, %c0_72] : memref<3x4x32x8xbf16, #tpu.memory_space<vmem>>, vector<1x1x32x8xbf16>
    %69 = vector.shape_cast %68 : vector<1x1x32x8xbf16> to vector<32x8xbf16>
    %cst_73 = arith.constant dense<0.000000e+00> : vector<16x8xf32>
    %70 = tpu.matmul %1, %69, %cst_73 {dimension_numbers = #tpu.dot_dimension_numbers<[1], [0], [0], [1], [0, 0, 1, 1], [], []>} : vector<16x32xbf16>, vector<32x8xbf16>, vector<16x8xf32> -> vector<16x8xf32>
    %c2_74 = arith.constant 2 : index
    %c0_75 = arith.constant 0 : index
    %c0_76 = arith.constant 0 : index
    %c0_77 = arith.constant 0 : index
    %71 = vector.load %arg3[%c2_74, %c0_75, %c0_76, %c0_77] : memref<3x4x1x8xf32, #tpu.memory_space<vmem>>, vector<1x1x1x8xf32>
    %72 = vector.shape_cast %71 : vector<1x1x1x8xf32> to vector<1x8xf32>
    %73 = vector.broadcast %72 : vector<1x8xf32> to vector<16x8xf32>
    %74 = arith.addf %70, %73 : vector<16x8xf32>
    %75 = vector.shape_cast %74 : vector<16x8xf32> to vector<2x8x8xf32>
    %c2_78 = arith.constant 2 : index
    %c1_79 = arith.constant 1 : index
    %c0_80 = arith.constant 0 : index
    %c0_81 = arith.constant 0 : index
    %76 = vector.load %arg2[%c2_78, %c1_79, %c0_80, %c0_81] : memref<3x4x32x8xbf16, #tpu.memory_space<vmem>>, vector<1x1x32x8xbf16>
    %77 = vector.shape_cast %76 : vector<1x1x32x8xbf16> to vector<32x8xbf16>
    %cst_82 = arith.constant dense<0.000000e+00> : vector<16x8xf32>
    %78 = tpu.matmul %1, %77, %cst_82 {dimension_numbers = #tpu.dot_dimension_numbers<[1], [0], [0], [1], [0, 0, 1, 1], [], []>} : vector<16x32xbf16>, vector<32x8xbf16>, vector<16x8xf32> -> vector<16x8xf32>
    %c2_83 = arith.constant 2 : index
    %c1_84 = arith.constant 1 : index
    %c0_85 = arith.constant 0 : index
    %c0_86 = arith.constant 0 : index
    %79 = vector.load %arg3[%c2_83, %c1_84, %c0_85, %c0_86] : memref<3x4x1x8xf32, #tpu.memory_space<vmem>>, vector<1x1x1x8xf32>
    %80 = vector.shape_cast %79 : vector<1x1x1x8xf32> to vector<1x8xf32>
    %81 = vector.broadcast %80 : vector<1x8xf32> to vector<16x8xf32>
    %82 = arith.addf %78, %81 : vector<16x8xf32>
    %83 = vector.shape_cast %82 : vector<16x8xf32> to vector<2x8x8xf32>
    %c2_87 = arith.constant 2 : index
    %c2_88 = arith.constant 2 : index
    %c0_89 = arith.constant 0 : index
    %c0_90 = arith.constant 0 : index
    %84 = vector.load %arg2[%c2_87, %c2_88, %c0_89, %c0_90] : memref<3x4x32x8xbf16, #tpu.memory_space<vmem>>, vector<1x1x32x8xbf16>
    %85 = vector.shape_cast %84 : vector<1x1x32x8xbf16> to vector<32x8xbf16>
    %cst_91 = arith.constant dense<0.000000e+00> : vector<16x8xf32>
    %86 = tpu.matmul %1, %85, %cst_91 {dimension_numbers = #tpu.dot_dimension_numbers<[1], [0], [0], [1], [0, 0, 1, 1], [], []>} : vector<16x32xbf16>, vector<32x8xbf16>, vector<16x8xf32> -> vector<16x8xf32>
    %c2_92 = arith.constant 2 : index
    %c2_93 = arith.constant 2 : index
    %c0_94 = arith.constant 0 : index
    %c0_95 = arith.constant 0 : index
    %87 = vector.load %arg3[%c2_92, %c2_93, %c0_94, %c0_95] : memref<3x4x1x8xf32, #tpu.memory_space<vmem>>, vector<1x1x1x8xf32>
    %88 = vector.shape_cast %87 : vector<1x1x1x8xf32> to vector<1x8xf32>
    %89 = vector.broadcast %88 : vector<1x8xf32> to vector<16x8xf32>
    %90 = arith.addf %86, %89 : vector<16x8xf32>
    %91 = vector.shape_cast %90 : vector<16x8xf32> to vector<2x8x8xf32>
    %c2_96 = arith.constant 2 : index
    %c3_97 = arith.constant 3 : index
    %c0_98 = arith.constant 0 : index
    %c0_99 = arith.constant 0 : index
    %92 = vector.load %arg2[%c2_96, %c3_97, %c0_98, %c0_99] : memref<3x4x32x8xbf16, #tpu.memory_space<vmem>>, vector<1x1x32x8xbf16>
    %93 = vector.shape_cast %92 : vector<1x1x32x8xbf16> to vector<32x8xbf16>
    %cst_100 = arith.constant dense<0.000000e+00> : vector<16x8xf32>
    %94 = tpu.matmul %1, %93, %cst_100 {dimension_numbers = #tpu.dot_dimension_numbers<[1], [0], [0], [1], [0, 0, 1, 1], [], []>} : vector<16x32xbf16>, vector<32x8xbf16>, vector<16x8xf32> -> vector<16x8xf32>
    %c2_101 = arith.constant 2 : index
    %c3_102 = arith.constant 3 : index
    %c0_103 = arith.constant 0 : index
    %c0_104 = arith.constant 0 : index
    %95 = vector.load %arg3[%c2_101, %c3_102, %c0_103, %c0_104] : memref<3x4x1x8xf32, #tpu.memory_space<vmem>>, vector<1x1x1x8xf32>
    %96 = vector.shape_cast %95 : vector<1x1x1x8xf32> to vector<1x8xf32>
    %97 = vector.broadcast %96 : vector<1x8xf32> to vector<16x8xf32>
    %98 = arith.addf %94, %97 : vector<16x8xf32>
    %99 = vector.shape_cast %98 : vector<16x8xf32> to vector<2x8x8xf32>
    %100 = tpu.concatenate %75, %83, %91, %99 in 0 : vector<2x8x8xf32>, vector<2x8x8xf32>, vector<2x8x8xf32>, vector<2x8x8xf32> -> vector<8x8x8xf32>
    %101 = arith.truncf %34 : vector<8x8x8xf32> to vector<8x8x8xbf16>
    %102 = arith.truncf %67 : vector<8x8x8xf32> to vector<8x8x8xbf16>
    "tpu.trace_start"() <{level = 10 : i32, message = "gqd,gkd->gqk"}> : () -> ()
    %cst_105 = arith.constant dense<0.000000e+00> : vector<8x8x8xf32>
    %103 = tpu.matmul %101, %102, %cst_105 {dimension_numbers = #tpu.dot_dimension_numbers<[2], [2], [1], [1], [0, 0, 0, 1, 1, 1], [0], [0]>} : vector<8x8x8xbf16>, vector<8x8x8xbf16>, vector<8x8x8xf32> -> vector<8x8x8xf32>
    "tpu.trace_stop"() : () -> ()
    %cst_106 = arith.constant dense<0xFF800000> : vector<8x8xf32>
    %104 = vector.multi_reduction <maximumf>, %103, %cst_106 [2] : vector<8x8x8xf32> to vector<8x8xf32>
    %105 = vector.shape_cast %104 : vector<8x8xf32> to vector<8x8x1xf32>
    %106 = vector.broadcast %105 : vector<8x8x1xf32> to vector<8x8x8xf32>
    %107 = arith.subf %103, %106 : vector<8x8x8xf32>
    %108 = math.exp %107 : vector<8x8x8xf32>
    %cst_107 = arith.constant dense<0.000000e+00> : vector<8x8xf32>
    %109 = vector.multi_reduction <add>, %108, %cst_107 [2] : vector<8x8x8xf32> to vector<8x8xf32>
    %110 = vector.shape_cast %109 : vector<8x8xf32> to vector<8x8x1xf32>
    %111 = tpu.reciprocal %110 {approx = true} : vector<8x8x1xf32> -> vector<8x8x1xf32>
    %112 = vector.broadcast %111 : vector<8x8x1xf32> to vector<8x8x8xf32>
    %113 = arith.mulf %108, %112 : vector<8x8x8xf32>
    %114 = arith.truncf %113 : vector<8x8x8xf32> to vector<8x8x8xbf16>
    %115 = arith.truncf %100 : vector<8x8x8xf32> to vector<8x8x8xbf16>
    "tpu.trace_start"() <{level = 10 : i32, message = "gqk,gkd->gqd"}> : () -> ()
    %cst_108 = arith.constant dense<0.000000e+00> : vector<8x8x8xf32>
    %116 = tpu.matmul %114, %115, %cst_108 {dimension_numbers = #tpu.dot_dimension_numbers<[2], [1], [1], [2], [0, 0, 0, 1, 1, 2], [0], [0]>} : vector<8x8x8xbf16>, vector<8x8x8xbf16>, vector<8x8x8xf32> -> vector<8x8x8xf32>
    "tpu.trace_stop"() : () -> ()
    %117 = vector.extract_strided_slice %116 {offsets = [0, 0, 0], sizes = [2, 8, 8], strides = [1, 1, 1]} : vector<8x8x8xf32> to vector<2x8x8xf32>
    %118 = vector.shape_cast %117 : vector<2x8x8xf32> to vector<16x8xf32>
    %119 = arith.truncf %118 : vector<16x8xf32> to vector<16x8xbf16>
    %c0_109 = arith.constant 0 : index
    %c0_110 = arith.constant 0 : index
    %c0_111 = arith.constant 0 : index
    %120 = vector.load %arg4[%c0_109, %c0_110, %c0_111] : memref<4x8x32xbf16, #tpu.memory_space<vmem>>, vector<1x8x32xbf16>
    %121 = vector.shape_cast %120 : vector<1x8x32xbf16> to vector<8x32xbf16>
    %cst_112 = arith.constant dense<0.000000e+00> : vector<16x32xf32>
    %122 = tpu.matmul %119, %121, %cst_112 {dimension_numbers = #tpu.dot_dimension_numbers<[1], [0], [0], [1], [0, 0, 1, 1], [], []>} : vector<16x8xbf16>, vector<8x32xbf16>, vector<16x32xf32> -> vector<16x32xf32>
    %123 = vector.extract_strided_slice %116 {offsets = [2, 0, 0], sizes = [2, 8, 8], strides = [1, 1, 1]} : vector<8x8x8xf32> to vector<2x8x8xf32>
    %124 = vector.shape_cast %123 : vector<2x8x8xf32> to vector<16x8xf32>
    %125 = arith.truncf %124 : vector<16x8xf32> to vector<16x8xbf16>
    %c1_113 = arith.constant 1 : index
    %c0_114 = arith.constant 0 : index
    %c0_115 = arith.constant 0 : index
    %126 = vector.load %arg4[%c1_113, %c0_114, %c0_115] : memref<4x8x32xbf16, #tpu.memory_space<vmem>>, vector<1x8x32xbf16>
    %127 = vector.shape_cast %126 : vector<1x8x32xbf16> to vector<8x32xbf16>
    %cst_116 = arith.constant dense<0.000000e+00> : vector<16x32xf32>
    %128 = tpu.matmul %125, %127, %cst_116 {dimension_numbers = #tpu.dot_dimension_numbers<[1], [0], [0], [1], [0, 0, 1, 1], [], []>} : vector<16x8xbf16>, vector<8x32xbf16>, vector<16x32xf32> -> vector<16x32xf32>
    %129 = arith.addf %122, %128 : vector<16x32xf32>
    %130 = vector.extract_strided_slice %116 {offsets = [4, 0, 0], sizes = [2, 8, 8], strides = [1, 1, 1]} : vector<8x8x8xf32> to vector<2x8x8xf32>
    %131 = vector.shape_cast %130 : vector<2x8x8xf32> to vector<16x8xf32>
    %132 = arith.truncf %131 : vector<16x8xf32> to vector<16x8xbf16>
    %c2_117 = arith.constant 2 : index
    %c0_118 = arith.constant 0 : index
    %c0_119 = arith.constant 0 : index
    %133 = vector.load %arg4[%c2_117, %c0_118, %c0_119] : memref<4x8x32xbf16, #tpu.memory_space<vmem>>, vector<1x8x32xbf16>
    %134 = vector.shape_cast %133 : vector<1x8x32xbf16> to vector<8x32xbf16>
    %cst_120 = arith.constant dense<0.000000e+00> : vector<16x32xf32>
    %135 = tpu.matmul %132, %134, %cst_120 {dimension_numbers = #tpu.dot_dimension_numbers<[1], [0], [0], [1], [0, 0, 1, 1], [], []>} : vector<16x8xbf16>, vector<8x32xbf16>, vector<16x32xf32> -> vector<16x32xf32>
    %136 = arith.addf %129, %135 : vector<16x32xf32>
    %137 = vector.extract_strided_slice %116 {offsets = [6, 0, 0], sizes = [2, 8, 8], strides = [1, 1, 1]} : vector<8x8x8xf32> to vector<2x8x8xf32>
    %138 = vector.shape_cast %137 : vector<2x8x8xf32> to vector<16x8xf32>
    %139 = arith.truncf %138 : vector<16x8xf32> to vector<16x8xbf16>
    %c3_121 = arith.constant 3 : index
    %c0_122 = arith.constant 0 : index
    %c0_123 = arith.constant 0 : index
    %140 = vector.load %arg4[%c3_121, %c0_122, %c0_123] : memref<4x8x32xbf16, #tpu.memory_space<vmem>>, vector<1x8x32xbf16>
    %141 = vector.shape_cast %140 : vector<1x8x32xbf16> to vector<8x32xbf16>
    %cst_124 = arith.constant dense<0.000000e+00> : vector<16x32xf32>
    %142 = tpu.matmul %139, %141, %cst_124 {dimension_numbers = #tpu.dot_dimension_numbers<[1], [0], [0], [1], [0, 0, 1, 1], [], []>} : vector<16x8xbf16>, vector<8x32xbf16>, vector<16x32xf32> -> vector<16x32xf32>
    %143 = arith.addf %136, %142 : vector<16x32xf32>
    %c0_125 = arith.constant 0 : index
    %c0_126 = arith.constant 0 : index
    %144 = vector.load %arg5[%c0_125, %c0_126] : memref<1x32xf32, #tpu.memory_space<vmem>>, vector<1x32xf32>
    %145 = vector.broadcast %144 : vector<1x32xf32> to vector<16x32xf32>
    %146 = arith.addf %143, %145 : vector<16x32xf32>
    %c0_127 = arith.constant 0 : index
    %c0_128 = arith.constant 0 : index
    %147 = vector.load %arg6[%c0_127, %c0_128] : memref<16x32xf32, #tpu.memory_space<vmem>>, vector<16x32xf32>
    tpu.vector_store %arg6[%c0_127, %c0_128], %146 {strides = array<i32>} : memref<16x32xf32, #tpu.memory_space<vmem>>, vector<16x32xf32>,
    return
  }
  func.func @transform_0(%arg0: i32) -> (i32, i32) {
    %c0_i32 = arith.constant 0 : i32
    %c0_i32_0 = arith.constant 0 : i32
    %c0_i32_1 = arith.constant 0 : i32
    return %c0_i32, %c0_i32_0 : i32, i32
  }
  func.func @transform_1(%arg0: i32) -> (i32, i32, i32, i32) {
    %c0_i32 = arith.constant 0 : i32
    %c0_i32_0 = arith.constant 0 : i32
    %c0_i32_1 = arith.constant 0 : i32
    %c0_i32_2 = arith.constant 0 : i32
    %c0_i32_3 = arith.constant 0 : i32
    return %c0_i32, %c0_i32_0, %c0_i32_1, %c0_i32_2 : i32, i32, i32, i32
  }
  func.func @transform_2(%arg0: i32) -> (i32, i32, i32, i32) {
    %c0_i32 = arith.constant 0 : i32
    %c0_i32_0 = arith.constant 0 : i32
    %c0_i32_1 = arith.constant 0 : i32
    %c0_i32_2 = arith.constant 0 : i32
    %c0_i32_3 = arith.constant 0 : i32
    return %c0_i32, %c0_i32_0, %c0_i32_1, %c0_i32_2 : i32, i32, i32, i32
  }
  func.func @transform_3(%arg0: i32) -> (i32, i32, i32) {
    %c0_i32 = arith.constant 0 : i32
    %c0_i32_0 = arith.constant 0 : i32
    %c0_i32_1 = arith.constant 0 : i32
    %c0_i32_2 = arith.constant 0 : i32
    return %c0_i32, %c0_i32_0, %c0_i32_1 : i32, i32, i32
  }
  func.func @transform_4(%arg0: i32) -> (i32, i32) {
    %c0_i32 = arith.constant 0 : i32
    %c0_i32_0 = arith.constant 0 : i32
    %c0_i32_1 = arith.constant 0 : i32
    return %c0_i32, %c0_i32_0 : i32, i32
  }
  func.func @transform_5(%arg0: i32) -> (i32, i32) {
    %c0_i32 = arith.constant 0 : i32
    %c0_i32_0 = arith.constant 0 : i32
    %c0_i32_1 = arith.constant 0 : i32
    return %c0_i32, %c0_i32_0 : i32, i32
  }
}

</mosaic_0001>

<bundles_post_ra>
// kernel: tpu_custom_call.1
= control target key start
LH: loop header
LB: loop body
LE: loop exit
PB: predicated region body
PF: predicated region fallthrough
CT: control target
= control target key end

     0   :  { %v2411_v1 = vmov 0.0   ;;  %vm2412_vm0 = vmmov 0   ;;  %vm48_vm1 = vcmask 261120   ;;  %s2832_s0 = inlined_call_operand.vmem [shape: f32[16,32], index: 0, kind: input, shape index: {}]   ;;  %s2833_s1 = inlined_call_operand.vmem [shape: bf16[3,4,32,8], index: 1, kind: input, shape index: {}]   ;;  %s2834_s2 = inlined_call_operand.vmem [shape: f32[3,4,1,8], index: 2, kind: input, shape index: {}]   ;;  %s2835_s3 = inlined_call_operand.vmem [shape: bf16[4,8,32], index: 3, kind: input, shape index: {}]   ;;  %s2836_s4 = inlined_call_operand.vmem [shape: f32[1,32], index: 4, kind: input, shape index: {}]   ;;  %s2837_s5 = inlined_call_operand.hbm [shape: f32[16,32], index: 5, kind: output, shape index: {}]  }
   0x1   :  { %v2331_v0 = vld [vmem:[%s2833_s1] sm:$0xff]   ;;  %2110 = vmatprep.subr.bf16.mxu0 %v2411_v1  ;;  %v2332_v2 = vld [vmem:[%s2833_s1 + $0x8] sm:$0xff]   ;;  %2118 = vmatprep.subr.bf16.mxu1 %v2411_v1  ;;  %v2333_v3 = vld [vmem:[%s2833_s1 + $0x10] sm:$0xff]  }
   0x2   :  { %2111 = vmatpush3.bf16.msra.mxu0 %v2331_v0  ;;  %2114 = vmatprep.mubr.msk.bf16.mxu0 %vm2412_vm0, %v2411_v1  ;;  %v22_v4 = vld [vmem:[%s2832_s0] sm:$0xff]  ;;  %v23_v5 = vld [vmem:[%s2832_s0 + $0x8] sm:$0xff]  ;;  %v2335_v7 = vld [vmem:[%s2833_s1 + $0x18] sm:$0xff]  }
   0x3   :  { %2112 = vmatprep.subr.bf16.mxu0 %v2411_v1  ;;  %2122 = vmatprep.mubr.msk.bf16.mxu1 %vm2412_vm0, %v2411_v1  ;;  %v2468_v6 = vpack.c.bf16 %v23_v5, %v22_v4  ;;  %v2334_v8 = vld [vmem:[%s2833_s1 + $0x20] sm:$0xff]   ;;  %v2337_v9 = vld [vmem:[%s2833_s1 + $0x30] sm:$0xff]   ;;  %v2336_v10 = vld [vmem:[%s2833_s1 + $0x28] sm:$0xff]  }
   0x4   :  { %2119 = vmatpush3.bf16.msra.mxu1 %v2333_v3  ;;  %v2339_v11 = vld [vmem:[%s2833_s1 + $0x38] sm:$0xff]   ;;  %v2338_v12 = vld [vmem:[%s2833_s1 + $0x40] sm:$0xff]   ;;  %v2341_v13 = vld [vmem:[%s2833_s1 + $0x50] sm:$0xff]  }
   0x5   :  { %2120 = vmatprep.subr.bf16.mxu1 %v2411_v1  ;;  %v2340_v14 = vld [vmem:[%s2833_s1 + $0x48] sm:$0xff]   ;;  %v2342_v15 = vld [vmem:[%s2833_s1 + $0x58] sm:$0xff]   ;;  %v2343_v16 = vld [vmem:[%s2833_s1 + $0x60] sm:$0xff]  }
   0x6   :  { %2113 = vmatpush3.bf16.msra.mxu0 %v2332_v2 }
   0x7   :  { %2126 = vmatprep.subr.bf16.mxu0 %v2411_v1 }
   0x8   :  { %2121 = vmatpush3.bf16.msra.mxu1 %v2335_v7 }
   0x9   :  { %2115 = vmatmul.mubr.msk.bf16.vlgmr.msra.gmra.mrb[0].mxu0 %vm48_vm1, %v2468_v6  ;;  %2134 = vmatprep.subr.bf16.mxu1 %v2411_v1 }
   0xa   :  { %2127 = vmatpush3.bf16.msra.mxu0 %v2334_v8  ;;  %2130 = vmatprep.mubr.msk.bf16.mxu0 %vm2412_vm0, %v2411_v1 }
   0xb   :  { %2128 = vmatprep.subr.bf16.mxu0 %v2411_v1  ;;  %2123 = vmatmul.mubr.msk.bf16.vlgmr.msra.gmra.mrb[0].mxu1 %vm48_vm1, %v2468_v6 }
   0xc   :  { %2135 = vmatpush3.bf16.msra.mxu1 %v2337_v9  ;;  %2138 = vmatprep.mubr.msk.bf16.mxu1 %vm2412_vm0, %v2411_v1 }
   0xd   :  { %2136 = vmatprep.subr.bf16.mxu1 %v2411_v1 }
   0xe   :  { %2129 = vmatpush3.bf16.msra.mxu0 %v2336_v10 }
   0xf   :  { %2142 = vmatprep.subr.bf16.mxu0 %v2411_v1 }
  0x10   :  { %2137 = vmatpush3.bf16.msra.mxu1 %v2339_v11 }
  0x11   :  { %2131 = vmatmul.mubr.msk.bf16.vlgmr.msra.gmra.mrb[4].mxu0 %vm48_vm1, %v2468_v6  ;;  %2150 = vmatprep.subr.bf16.mxu1 %v2411_v1 }
  0x12   :  { %2143 = vmatpush3.bf16.msra.mxu0 %v2338_v12  ;;  %2146 = vmatprep.mubr.msk.bf16.mxu0 %vm2412_vm0, %v2411_v1 }
  0x13   :  { %2144 = vmatprep.subr.bf16.mxu0 %v2411_v1  ;;  %2139 = vmatmul.mubr.msk.bf16.vlgmr.msra.gmra.mrb[4].mxu1 %vm48_vm1, %v2468_v6 }
  0x14   :  { %2151 = vmatpush3.bf16.msra.mxu1 %v2341_v13  ;;  %2154 = vmatprep.mubr.msk.bf16.mxu1 %vm2412_vm0, %v2411_v1 }
  0x15   :  { %2152 = vmatprep.subr.bf16.mxu1 %v2411_v1 }
  0x16   :  { %2145 = vmatpush3.bf16.msra.mxu0 %v2340_v14 }
  0x17   :  { %10 = vsyncpa [#allocation3], 0  ;;  %2158 = vmatprep.subr.bf16.mxu0 %v2411_v1  ;;  %v2345_v17 = vld [vmem:[%s2833_s1 + $0x70] sm:$0xff]   ;;  %v2344_v18 = vld [vmem:[%s2833_s1 + $0x68] sm:$0xff]   ;;  %vm835_vm2 = vcmask 64512   ;;  %vm1311_vm3 = vcmask 1043456  }
  0x18   :  { %2153 = vmatpush3.bf16.msra.mxu1 %v2342_v15  ;;  %v2346_v19 = vld [vmem:[%s2833_s1 + $0x78] sm:$0xff]   ;;  %v2347_v20 = vld [vmem:[%s2833_s1 + $0x80] sm:$0xff]   ;;  %v2348_v21 = vld [vmem:[%s2833_s1 + $0x88] sm:$0xff]   ;;  %s2413_s22 = smov [#allocation2]  }
  0x19   :  { %2147 = vmatmul.mubr.msk.bf16.vlgmr.msra.gmra.mrb[8].mxu0 %vm48_vm1, %v2468_v6  ;;  %2166 = vmatprep.subr.bf16.mxu1 %v2411_v1  ;;  %v2349_v22 = vld [vmem:[%s2833_s1 + $0x90] sm:$0xff]   ;;  %v2350_v23 = vld [vmem:[%s2833_s1 + $0x98] sm:$0xff]   ;;  %v2351_v24 = vld [vmem:[%s2833_s1 + $0xa0] sm:$0xff]   ;;  %s1896_s23 = sshll.u32 %s2413_s22, 4  ;;  %s1897_s23 = int_to_ptr.vmem [resolvable:$true] %s1896_s23 }
  0x1a   :  { %2159 = vmatpush3.bf16.msra.mxu0 %v2343_v16  ;;  %2162 = vmatprep.mubr.msk.bf16.mxu0 %vm2412_vm0, %v2411_v1  ;;  %v2352_v25 = vld [vmem:[%s2833_s1 + $0xb0] sm:$0xff]   ;;  %v2353_v26 = vld [vmem:[%s2833_s1 + $0xa8] sm:$0xff]   ;;  %v2354_v27 = vld [vmem:[%s2833_s1 + $0xb8] sm:$0xff]   ;;  %s2387_s24 = scalar_lea.vmem %s1897_s23, 256  ;;  %p2392_p1 = scmp.lt.s32.totalorder %s1897_s23, %s1897_s23 }
  0x1b   :  { %2155 = vmatmul.mubr.msk.bf16.vlgmr.msra.gmra.mrb[8].mxu1 %vm48_vm1, %v2468_v6  ;;  %2160 = vmatprep.subr.bf16.mxu0 %v2411_v1  ;;  %v1943_v44 = vld [vmem:[%s2834_s2 + $0x4] ss:$0 sm:$0xff]  ;;  %v1952_v46 = vld [vmem:[%s2834_s2 + $0x5] ss:$0 sm:$0xff]  ;;  %v1907_v56 = vld [vmem:[%s2834_s2] ss:$0 sm:$0xff]  ;;  %p2388_p0 = scmp.ne.s32.totalorder %s1897_s23, %s2387_s24  ;;  %p2393_p2 = scmp.lt.s32.totalorder %s2387_s24, %s2387_s24 }
  0x1c   :  { %2167 = vmatpush3.bf16.msra.mxu1 %v2345_v17  ;;  %2170 = vmatprep.mubr.msk.bf16.mxu1 %vm2412_vm0, %v2411_v1  ;;  %v1961_v2 = vld [vmem:[%s2834_s2 + $0x6] ss:$0 sm:$0xff]  ;;  %v1916_v14 = vld [vmem:[%s2834_s2 + $0x1] ss:$0 sm:$0xff] }
  0x1d   :  { %2168 = vmatprep.subr.bf16.mxu1 %v2411_v1  ;;  %p2394_p3 = por %p2393_p2, %p2392_p1 }
  0x1e   :  { %2161 = vmatpush3.bf16.msra.mxu0 %v2344_v18 }
  0x1f   :  { %2174 = vmatprep.subr.bf16.mxu0 %v2411_v1  ;;  %p2395_p4 = pnand %p2394_p3, %p2388_p0 }
  0x20   :  { %2169 = vmatpush3.bf16.msra.mxu1 %v2346_v19 }
  0x21   :  { %2163 = vmatmul.mubr.msk.bf16.vlgmr.msra.gmra.mrb[12].mxu0 %vm48_vm1, %v2468_v6  ;;  %2182 = vmatprep.subr.bf16.mxu1 %v2411_v1 }
  0x22   :  { %2175 = vmatpush3.bf16.msra.mxu0 %v2347_v20  ;;  %2178 = vmatprep.mubr.msk.bf16.mxu0 %vm2412_vm0, %v2411_v1 }
  0x23   :  { %2171 = vmatmul.mubr.msk.bf16.vlgmr.msra.gmra.mrb[12].mxu1 %vm48_vm1, %v2468_v6  ;;  %2176 = vmatprep.subr.bf16.mxu0 %v2411_v1 }
  0x24   :  { %2186 = vmatprep.mubr.msk.bf16.mxu1 %vm2412_vm0, %v2411_v1  ;;  %2183 = vmatpush3.bf16.msra.mxu1 %v2349_v22  ;;  %v1970_v22 = vld [vmem:[%s2834_s2 + $0x7] ss:$0 sm:$0xff] }
  0x25   :  { %2184 = vmatprep.subr.bf16.mxu1 %v2411_v1 }
  0x26   :  { %2177 = vmatpush3.bf16.msra.mxu0 %v2348_v21 }
  0x27   :  { %2190 = vmatprep.subr.bf16.mxu0 %v2411_v1 }
  0x28   :  { %2185 = vmatpush3.bf16.msra.mxu1 %v2350_v23 }
  0x29   :  { %2179 = vmatmul.mubr.msk.bf16.vlgmr.msra.gmra.mrb[16].mxu0 %vm48_vm1, %v2468_v6  ;;  %2198 = vmatprep.subr.bf16.mxu1 %v2411_v1 }
  0x2a   :  { %2194 = vmatprep.mubr.msk.bf16.mxu0 %vm2412_vm0, %v2411_v1  ;;  %2191 = vmatpush3.bf16.msra.mxu0 %v2351_v24 }
  0x2b   :  { %2187 = vmatmul.mubr.msk.bf16.vlgmr.msra.gmra.mrb[16].mxu1 %vm48_vm1, %v2468_v6  ;;  %2192 = vmatprep.subr.bf16.mxu0 %v2411_v1 }
  0x2c   :  { %2199 = vmatpush3.bf16.msra.mxu1 %v2352_v25  ;;  %2202 = vmatprep.mubr.msk.bf16.mxu1 %vm2412_vm0, %v2411_v1 }
  0x2d   :  { %2200 = vmatprep.subr.bf16.mxu1 %v2411_v1 }
  0x2e   :  { %2193 = vmatpush3.bf16.msra.mxu0 %v2353_v26 }
  0x2f   :  { %2206 = vmatprep.subr.bf16.mxu0 %v2411_v1 }
  0x30   :  { %2201 = vmatpush3.bf16.msra.mxu1 %v2354_v27 }
  0x31   :  { %2195 = vmatmul.mubr.msk.bf16.vlgmr.msra.gmra.mrb[20].mxu0 %vm48_vm1, %v2468_v6  ;;  %2212 = vmatprep.subr.bf16.mxu1 %v2411_v1 }
  0x32   :  { %2208 = vmatprep.mubr.msk.bf16.mxu0 %vm2412_vm0, %v2411_v1 }
  0x33   :  { %2203 = vmatmul.mubr.msk.bf16.vlgmr.msra.gmra.mrb[20].mxu1 %vm48_vm1, %v2468_v6 }
  0x34   :  { %2214 = vmatprep.mubr.msk.bf16.mxu1 %vm2412_vm0, %v2411_v1 }
  0xdc   :  { %v86_v28 = vpop.f32.mrb[0].mxu0 }
  0xdd   :  { %v2116_v29 = vpop.f32.mrb[1].mxu0  ;;  %v87_v61 = vadd.f32 %v1907_v56, %v86_v28  ;;  %v1925_v28 = vld [vmem:[%s2834_s2 + $0x2] ss:$0 sm:$0xff] }
  0xde   :  { %v89_v30 = vpop.f32.mrb[2].mxu0  ;;  %v152_v31 = vpop.f32.mrb[0].mxu1 }
  0xdf   :  { %v2117_v32 = vpop.f32.mrb[3].mxu0  ;;  %v2124_v33 = vpop.f32.mrb[1].mxu1  ;;  %v90_v4 = vadd.f32 %v1907_v56, %v89_v30  ;;  %v819_v8 = vpack.c.bf16 %v87_v61, %v87_v61  ;;  %v153_v19 = vadd.f32 %v1916_v14, %v152_v31 }
  0xe0   :  { %v2604_v34 = vpop.f32.mrb[2].mxu1 }
  0xe1   :  { %v2125_v35 = vpop.f32.mrb[3].mxu1  ;;  %v820_v16 = vpack.c.bf16 %v90_v4, %v90_v4  ;;  %v156_v23 = vadd.f32 %v1916_v14, %v2604_v34  ;;  %v821_v25 = vpack.c.bf16 %v153_v19, %v153_v19 }
  0xe3   :  { %v822_v29 = vpack.c.bf16 %v156_v23, %v156_v23 }
  0xe4   :  { %v2606_v36 = vpop.f32.mrb[4].mxu0 }
  0xe5   :  { %v2132_v37 = vpop.f32.mrb[5].mxu0  ;;  %v219_v32 = vadd.f32 %v1925_v28, %v2606_v36  ;;  %v1934_v36 = vld [vmem:[%s2834_s2 + $0x3] ss:$0 sm:$0xff] }
  0xe6   :  { %v2608_v38 = vpop.f32.mrb[6].mxu0  ;;  %v2610_v39 = vpop.f32.mrb[4].mxu1 }
  0xe7   :  { %v2133_v40 = vpop.f32.mrb[7].mxu0  ;;  %v2140_v41 = vpop.f32.mrb[5].mxu1  ;;  %v222_v34 = vadd.f32 %v1925_v28, %v2608_v38  ;;  %v823_v37 = vpack.c.bf16 %v219_v32, %v219_v32  ;;  %v285_v38 = vadd.f32 %v1934_v36, %v2610_v39  ;;  %v1979_v39 = vld [vmem:[%s2834_s2 + $0x8] ss:$0 sm:$0xff] }
  0xe8   :  { %v2612_v42 = vpop.f32.mrb[6].mxu1 }
  0xe9   :  { %v2141_v43 = vpop.f32.mrb[7].mxu1  ;;  %v824_v41 = vpack.c.bf16 %v222_v34, %v222_v34 }
  0xec   :  { %v350_v45 = vpop.f32.mrb[8].mxu0 }
  0xed   :  { %v351_v47 = vadd.f32 %v1943_v44, %v350_v45  ;;  %v2148_v48 = vpop.f32.mrb[9].mxu0  ;;  %v825_v45 = vpack.c.bf16 %v285_v38, %v285_v38 }
  0xee   :  { %v353_v49 = vpop.f32.mrb[10].mxu0  ;;  %v416_v50 = vpop.f32.mrb[8].mxu1 }
  0xef   :  { %v827_v51 = vpack.c.bf16 %v351_v47, %v351_v47  ;;  %v354_v52 = vadd.f32 %v1943_v44, %v353_v49  ;;  %v2149_v53 = vpop.f32.mrb[11].mxu0  ;;  %v417_v54 = vadd.f32 %v1952_v46, %v416_v50  ;;  %v2156_v55 = vpop.f32.mrb[9].mxu1  ;;  %v288_v44 = vadd.f32 %v1934_v36, %v2612_v42 }
  0xf0   :  { %v419_v57 = vpop.f32.mrb[10].mxu1 }
  0xf1   :  { %v840_v58 = vsel %vm835_vm2, %v827_v51, 0  ;;  %v828_v59 = vpack.c.bf16 %v354_v52, %v354_v52  ;;  %v2157_v60 = vpop.f32.mrb[11].mxu1  ;;  %v829_v63 = vpack.c.bf16 %v417_v54, %v417_v54  ;;  %v420_v0 = vadd.f32 %v1952_v46, %v419_v57 }
  0xf2   :  { %2207 = vmatpush3.bf16.xpose.msra.mxu0 %v840_v58  ;;  %v826_v46 = vpack.c.bf16 %v288_v44, %v288_v44 }
  0xf3   :  { %v886_v62 = vsel %vm835_vm2, %v828_v59, 0  ;;  %2218 = vmatprep.subr.bf16.mxu0 %v2411_v1  ;;  %v932_v9 = vsel %vm835_vm2, %v829_v63, 0  ;;  %v830_v10 = vpack.c.bf16 %v420_v0, %v420_v0 }
  0xf4   :  { %2213 = vmatpush3.bf16.xpose.msra.mxu1 %v886_v62  ;;  %v482_v3 = vpop.f32.mrb[12].mxu0 }
  0xf5   :  { %2224 = vmatprep.subr.bf16.mxu1 %v2411_v1  ;;  %v2164_v5 = vpop.f32.mrb[13].mxu0  ;;  %v483_v11 = vadd.f32 %v1961_v2, %v482_v3  ;;  %v978_v20 = vsel %vm835_vm2, %v830_v10, 0 }
  0xf6   :  { %v485_v6 = vpop.f32.mrb[14].mxu0  ;;  %v548_v7 = vpop.f32.mrb[12].mxu1 }
  0xf7   :  { %v2165_v12 = vpop.f32.mrb[15].mxu0  ;;  %v2172_v13 = vpop.f32.mrb[13].mxu1  ;;  %v486_v17 = vadd.f32 %v1961_v2, %v485_v6  ;;  %v831_v21 = vpack.c.bf16 %v483_v11, %v483_v11  ;;  %v549_v27 = vadd.f32 %v1970_v22, %v548_v7 }
  0xf8   :  { %v551_v15 = vpop.f32.mrb[14].mxu1 }
  0xf9   :  { %2209 = vmatmul.mubr.msk.bf16.vlgmr.msra.gmra.mrb[24].mxu0 %vm835_vm2, %v819_v8  ;;  %v2173_v18 = vpop.f32.mrb[15].mxu1  ;;  %v832_v24 = vpack.c.bf16 %v486_v17, %v486_v17  ;;  %v1024_v26 = vsel %vm835_vm2, %v831_v21, 0  ;;  %v552_v31 = vadd.f32 %v1970_v22, %v551_v15  ;;  %v833_v33 = vpack.c.bf16 %v549_v27, %v549_v27 }
  0xfa   :  { %2219 = vmatpush3.bf16.xpose.msra.mxu0 %v932_v9  ;;  %2220 = vmatprep.mubr.msk.bf16.mxu0 %vm2412_vm0, %v2411_v1 }
  0xfb   :  { %2215 = vmatmul.mubr.msk.bf16.vlgmr.msra.gmra.mrb[24].mxu1 %vm835_vm2, %v820_v16  ;;  %2230 = vmatprep.subr.bf16.mxu0 %v2411_v1  ;;  %v1070_v30 = vsel %vm835_vm2, %v832_v24, 0  ;;  %v834_v35 = vpack.c.bf16 %v552_v31, %v552_v31  ;;  %v1116_v40 = vsel %vm835_vm2, %v833_v33, 0 }
  0xfc   :  { %2225 = vmatpush3.bf16.xpose.msra.mxu1 %v978_v20  ;;  %2226 = vmatprep.mubr.msk.bf16.mxu1 %vm2412_vm0, %v2411_v1  ;;  %v614_v47 = vpop.f32.mrb[16].mxu0 }
  0xfd   :  { %2236 = vmatprep.subr.bf16.mxu1 %v2411_v1  ;;  %v1162_v43 = vsel %vm835_vm2, %v834_v35, 0  ;;  %v615_v42 = vadd.f32 %v1979_v39, %v614_v47  ;;  %v2180_v48 = vpop.f32.mrb[17].mxu0 }
  0xfe   :  { %v617_v49 = vpop.f32.mrb[18].mxu0  ;;  %v2686_v53 = vpop.f32.mrb[16].mxu1 }
  0xff   :  { %v1300_v50 = vpack.c.bf16 %v615_v42, %v615_v42  ;;  %v618_v51 = vadd.f32 %v1979_v39, %v617_v49  ;;  %v2181_v52 = vpop.f32.mrb[19].mxu0  ;;  %v2188_v56 = vpop.f32.mrb[17].mxu1 }
 0x100   :  { %v2689_v57 = vpop.f32.mrb[18].mxu1 }
 0x101   :  { %2221 = vmatmul.mubr.msk.bf16.vlgmr.msra.gmra.mrb[28].mxu0 %vm835_vm2, %v821_v25  ;;  %v1313_v54 = vsel %vm1311_vm3, %v1300_v50, 0  ;;  %v1301_v55 = vpack.c.bf16 %v618_v51, %v618_v51  ;;  %v2189_v59 = vpop.f32.mrb[19].mxu1 }
 0x102   :  { %2231 = vmatpush3.bf16.xpose.msra.mxu0 %v1024_v26  ;;  %2232 = vmatprep.mubr.msk.bf16.mxu0 %vm2412_vm0, %v2411_v1 }
 0x103   :  { %2227 = vmatmul.mubr.msk.bf16.vlgmr.msra.gmra.mrb[28].mxu1 %vm835_vm2, %v822_v29  ;;  %2242 = vmatprep.subr.bf16.mxu0 %v2411_v1  ;;  %v1359_v58 = vsel %vm1311_vm3, %v1301_v55, 0 }
 0x104   :  { %2237 = vmatpush3.bf16.xpose.msra.mxu1 %v1070_v30  ;;  %2238 = vmatprep.mubr.msk.bf16.mxu1 %vm2412_vm0, %v2411_v1  ;;  %v2694_v60 = vpop.f32.mrb[20].mxu0 }
 0x105   :  { %2248 = vmatprep.subr.bf16.mxu1 %v2411_v1  ;;  %v2196_v61 = vpop.f32.mrb[21].mxu0 }
 0x106   :  { %v2696_v62 = vpop.f32.mrb[22].mxu0  ;;  %v2698_v63 = vpop.f32.mrb[20].mxu1 }
 0x107   :  { %v2197_v0 = vpop.f32.mrb[23].mxu0  ;;  %v2204_v2 = vpop.f32.mrb[21].mxu1 }
 0x108   :  { %v2700_v3 = vpop.f32.mrb[22].mxu1 }
 0x109   :  { %2233 = vmatmul.mubr.msk.bf16.vlgmr.msra.gmra.mrb[32].mxu0 %vm835_vm2, %v823_v37  ;;  %v2205_v4 = vpop.f32.mrb[23].mxu1 }
 0x10a   :  { %2243 = vmatpush3.bf16.xpose.msra.mxu0 %v1116_v40  ;;  %2244 = vmatprep.mubr.msk.bf16.mxu0 %vm2412_vm0, %v2411_v1 }
 0x10b   :  { %2239 = vmatmul.mubr.msk.bf16.vlgmr.msra.gmra.mrb[32].mxu1 %vm835_vm2, %v824_v41  ;;  %2254 = vmatprep.subr.bf16.mxu0 %v2411_v1 }
 0x10c   :  { %2249 = vmatpush3.bf16.xpose.msra.mxu1 %v1162_v43  ;;  %2250 = vmatprep.mubr.msk.bf16.mxu1 %vm2412_vm0, %v2411_v1 }
 0x10d   :  { %2260 = vmatprep.subr.bf16.mxu1 %v2411_v1 }
 0x111   :  { %2245 = vmatmul.mubr.msk.bf16.vlgmr.msra.gmra.mrb[36].mxu0 %vm835_vm2, %v825_v45 }
 0x112   :  { %2256 = vmatprep.mubr.msk.bf16.mxu0 %vm2412_vm0, %v2411_v1  ;;  %2255 = vmatpush3.bf16.msra.mxu0 %v1313_v54 }
 0x113   :  { %2251 = vmatmul.mubr.msk.bf16.vlgmr.msra.gmra.mrb[36].mxu1 %vm835_vm2, %v826_v46  ;;  %2266 = vmatprep.subr.bf16.mxu0 %v2411_v1 }
 0x114   :  { %2262 = vmatprep.mubr.msk.bf16.mxu1 %vm2412_vm0, %v2411_v1  ;;  %2261 = vmatpush3.bf16.msra.mxu1 %v1359_v58 }
 0x115   :  { %2272 = vmatprep.subr.bf16.mxu1 %v2411_v1 }
 0x1cc   :  { %v876_v5 = vpop.f32.mrb[24].mxu0 }
 0x1cd   :  { %v2210_v6 = vpop.f32.mrb[25].mxu0  ;;  %v1204_v7 = vsel %vm835_vm2, %v876_v5, -inf }
 0x1ce   :  { %v922_v8 = vpop.f32.mrb[24].mxu1  ;;  %1205 = vmax.xlane.f32.xlu0 %v1204_v7  ;;  %v879_v9 = vpop.f32.mrb[26].mxu0 }
 0x1cf   :  { %v2211_v10 = vpop.f32.mrb[27].mxu0  ;;  %v2216_v11 = vpop.f32.mrb[25].mxu1  ;;  %v1207_v14 = vsel %vm835_vm2, %v922_v8, -inf }
 0x1d0   :  { %v925_v12 = vpop.f32.mrb[26].mxu1 }
 0x1d1   :  { %v2217_v13 = vpop.f32.mrb[27].mxu1 }
 0x1d2   :  { %1208 = vmax.xlane.f32.xlu0 %v1207_v14 }
 0x1d4   :  { %v968_v15 = vpop.f32.mrb[28].mxu0 }
 0x1d5   :  { %v2222_v16 = vpop.f32.mrb[29].mxu0  ;;  %v1210_v17 = vsel %vm835_vm2, %v968_v15, -inf }
 0x1d6   :  { %v1014_v18 = vpop.f32.mrb[28].mxu1  ;;  %1211 = vmax.xlane.f32.xlu1 %v1210_v17  ;;  %v971_v19 = vpop.f32.mrb[30].mxu0 }
 0x1d7   :  { %v2223_v20 = vpop.f32.mrb[31].mxu0  ;;  %v2228_v21 = vpop.f32.mrb[29].mxu1  ;;  %v1213_v24 = vsel %vm835_vm2, %v1014_v18, -inf }
 0x1d8   :  { %v1017_v22 = vpop.f32.mrb[30].mxu1 }
 0x1d9   :  { %v2229_v23 = vpop.f32.mrb[31].mxu1 }
 0x1da   :  { %1214 = vmax.xlane.f32.xlu1 %v1213_v24 }
 0x1dc   :  { %v1060_v25 = vpop.f32.mrb[32].mxu0 }
 0x1dd   :  { %v2234_v26 = vpop.f32.mrb[33].mxu0  ;;  %v1216_v27 = vsel %vm835_vm2, %v1060_v25, -inf }
 0x1de   :  { %v1106_v28 = vpop.f32.mrb[32].mxu1  ;;  %1217 = vmax.xlane.f32.xlu0 %v1216_v27  ;;  %v1063_v29 = vpop.f32.mrb[34].mxu0 }
 0x1df   :  { %v2235_v30 = vpop.f32.mrb[35].mxu0  ;;  %v2240_v31 = vpop.f32.mrb[33].mxu1  ;;  %v1219_v32 = vsel %vm835_vm2, %v1106_v28, -inf }
 0x1e0   :  { %v1109_v33 = vpop.f32.mrb[34].mxu1  ;;  %1220 = vmax.xlane.f32.xlu1 %v1219_v32  ;;  %v1988_v30 = vld [vmem:[%s2834_s2 + $0x9] ss:$0 sm:$0xff] }
 0x1e1   :  { %v2241_v34 = vpop.f32.mrb[35].mxu1  ;;  %v681_v31 = vadd.f32 %v1988_v30, %v2686_v53 }
 0x1e3   :  { %v1302_v34 = vpack.c.bf16 %v681_v31, %v681_v31 }
 0x1e4   :  { %v1152_v35 = vpop.f32.mrb[36].mxu0 }
 0x1e5   :  { %v2246_v37 = vpop.f32.mrb[37].mxu0  ;;  %v1222_v40 = vsel %vm835_vm2, %v1152_v35, -inf }
 0x1e6   :  { %v1198_v36 = vpop.f32.mrb[36].mxu1  ;;  %1223 = vmax.xlane.f32.xlu0 %v1222_v40  ;;  %v1155_v41 = vpop.f32.mrb[38].mxu0 }
 0x1e7   :  { %v2247_v43 = vpop.f32.mrb[39].mxu0  ;;  %v2252_v38 = vpop.f32.mrb[37].mxu1  ;;  %v1225_v44 = vsel %vm835_vm2, %v1198_v36, -inf }
 0x1e8   :  { %v1201_v45 = vpop.f32.mrb[38].mxu1  ;;  %1226 = vmax.xlane.f32.xlu1 %v1225_v44  ;;  %v1405_v38 = vsel %vm1311_vm3, %v1302_v34, 0 }
 0x1e9   :  { %v2253_v46 = vpop.f32.mrb[39].mxu1 }
 0x25b   :  { %v1206_v39 = vpop.xlane.xlu0 %1205 }
 0x25c   :  { %v1228_v47 = vsub.f32 %v876_v5, %v1206_v39 }
 0x25e   :  { %v1236_v42 = vmul.f32 1.442695, %v1228_v47 }
 0x25f   :  { %v1209_v48 = vpop.xlane.xlu0 %1208 }
 0x260   :  { %2355 = vpow2.f32 %v1236_v42  ;;  %v1229_v49 = vsub.f32 %v922_v8, %v1209_v48 }
 0x262   :  { %v1238_v50 = vmul.f32 1.442695, %v1229_v49 }
 0x263   :  { %v1212_v51 = vpop.xlane.xlu1 %1211 }
 0x264   :  { %2357 = vpow2.f32 %v1238_v50  ;;  %v1230_v52 = vsub.f32 %v968_v15, %v1212_v51  ;;  %v2006_v50 = vld [vmem:[%s2834_s2 + $0xb] ss:$0 sm:$0xff] }
 0x266   :  { %v1240_v54 = vmul.f32 1.442695, %v1230_v52 }
 0x267   :  { %v1215_v55 = vpop.xlane.xlu1 %1214 }
 0x268   :  { %2359 = vpow2.f32 %v1240_v54  ;;  %v1231_v56 = vsub.f32 %v1014_v18, %v1215_v55 }
 0x26a   :  { %v2356_v58 = vpop.eup %2355  ;;  %v1242_v59 = vmul.f32 1.442695, %v1231_v56 }
 0x26b   :  { %v1218_v61 = vpop.xlane.xlu0 %1217  ;;  %v1252_v0 = vsel %vm835_vm2, %v2356_v58, 0.0 }
 0x26c   :  { %2361 = vpow2.f32 %v1242_v59  ;;  %v1232_v2 = vsub.f32 %v1060_v25, %v1218_v61  ;;  %1253 = vadd.xlane.f32.xlu0 %v1252_v0 }
 0x26d   :  { %v1221_v4 = vpop.xlane.xlu1 %1220 }
 0x26e   :  { %v2358_v5 = vpop.eup %2357  ;;  %v1244_v6 = vmul.f32 1.442695, %v1232_v2  ;;  %v1233_v7 = vsub.f32 %v1106_v28, %v1221_v4 }
 0x26f   :  { %v1255_v8 = vsel %vm835_vm2, %v2358_v5, 0.0 }
 0x270   :  { %2363 = vpow2.f32 %v1244_v6  ;;  %v1246_v9 = vmul.f32 1.442695, %v1233_v7  ;;  %1256 = vadd.xlane.f32.xlu1 %v1255_v8 }
 0x272   :  { %v2360_v10 = vpop.eup %2359  ;;  %2365 = vpow2.f32 %v1246_v9 }
 0x273   :  { %v1224_v11 = vpop.xlane.xlu0 %1223  ;;  %v1258_v12 = vsel %vm835_vm2, %v2360_v10, 0.0 }
 0x274   :  { %v1234_v13 = vsub.f32 %v1152_v35, %v1224_v11  ;;  %1259 = vadd.xlane.f32.xlu0 %v1258_v12  ;;  %v684_v35 = vadd.f32 %v1988_v30, %v2689_v57 }
 0x275   :  { %v1227_v14 = vpop.xlane.xlu1 %1226 }
 0x276   :  { %v2713_v15 = vpop.eup %2361  ;;  %v1248_v16 = vmul.f32 1.442695, %v1234_v13  ;;  %v1235_v17 = vsub.f32 %v1198_v36, %v1227_v14  ;;  %v1997_v36 = vld [vmem:[%s2834_s2 + $0xa] ss:$0 sm:$0xff]  ;;  %v1303_v44 = vpack.c.bf16 %v684_v35, %v684_v35 }
 0x277   :  { %v1261_v18 = vsel %vm835_vm2, %v2713_v15, 0.0  ;;  %v747_v53 = vadd.f32 %v1997_v36, %v2694_v60  ;;  %v750_v60 = vadd.f32 %v1997_v36, %v2696_v62  ;;  %v813_v62 = vadd.f32 %v2006_v50, %v2698_v63 }
 0x278   :  { %2367 = vpow2.f32 %v1248_v16  ;;  %v1250_v19 = vmul.f32 1.442695, %v1235_v17  ;;  %1262 = vadd.xlane.f32.xlu1 %v1261_v18  ;;  %v1451_v42 = vsel %vm1311_vm3, %v1303_v44, 0  ;;  %v816_v63 = vadd.f32 %v2006_v50, %v2700_v3  ;;  %v1678_v18 = vld [vmem:[%s2835_s3] sm:$0xf] }
 0x279   :  { %v1304_v48 = vpack.c.bf16 %v747_v53, %v747_v53  ;;  %v1305_v55 = vpack.c.bf16 %v750_v60, %v750_v60  ;;  %v1306_v4 = vpack.c.bf16 %v813_v62, %v813_v62 }
 0x27a   :  { %v2717_v20 = vpop.eup %2363  ;;  %2369 = vpow2.f32 %v1250_v19  ;;  %v1733_v19 = vsel %vm1311_vm3, %v1678_v18, 0 }
 0x27b   :  { %v1264_v21 = vsel %vm835_vm2, %v2717_v20, 0.0  ;;  %v1497_v54 = vsel %vm1311_vm3, %v1304_v48, 0  ;;  %v1543_v2 = vsel %vm1311_vm3, %v1305_v55, 0  ;;  %v1589_v9 = vsel %vm1311_vm3, %v1306_v4, 0 }
 0x27c   :  { %v2721_v22 = vpop.eup %2365  ;;  %1265 = vadd.xlane.f32.xlu0 %v1264_v21 }
 0x27d   :  { %v1267_v23 = vsel %vm835_vm2, %v2721_v22, 0.0 }
 0x27e   :  { %1268 = vadd.xlane.f32.xlu1 %v1267_v23 }
 0x282   :  { %v2725_v24 = vpop.eup %2367 }
 0x283   :  { %v1270_v25 = vsel %vm835_vm2, %v2725_v24, 0.0 }
 0x284   :  { %v2729_v26 = vpop.eup %2369  ;;  %1271 = vadd.xlane.f32.xlu0 %v1270_v25  ;;  %v2031_v25 = vld [vmem:[%s2835_s3 + $0xc] sm:$0xf] }
 0x285   :  { %v1273_v27 = vsel %vm835_vm2, %v2729_v26, 0.0  ;;  %v1835_v30 = vsel %vm1311_vm3, %v2031_v25, 0 }
 0x286   :  { %1274 = vadd.xlane.f32.xlu1 %v1273_v27 }
 0x2f9   :  { %v1254_v28 = vpop.xlane.xlu0 %1253 }
 0x2fa   :  { %2371 = vrcp.f32 %v1254_v28 }
 0x2fd   :  { %v1257_v29 = vpop.xlane.xlu1 %1256 }
 0x2fe   :  { %2373 = vrcp.f32 %v1257_v29 }
 0x301   :  { %v1260_v32 = vpop.xlane.xlu0 %1259 }
 0x302   :  { %2375 = vrcp.f32 %v1260_v32 }
 0x304   :  { %v2372_v33 = vpop.eup %2371 }
 0x305   :  { %v1284_v37 = vmul.f32 %v2372_v33, %v2356_v58  ;;  %v1263_v40 = vpop.xlane.xlu1 %1262 }
 0x306   :  { %2377 = vrcp.f32 %v1263_v40 }
 0x307   :  { %v1292_v41 = vpack.c.bf16 %v1284_v37, %v1284_v37  ;;  %v2029_v37 = vld [vmem:[%s2835_s3 + $0x8] sm:$0xf] }
 0x308   :  { %v2374_v43 = vpop.eup %2373 }
 0x309   :  { %v1285_v45 = vmul.f32 %v2374_v43, %v2358_v5  ;;  %2257 = vmatmul.mubr.msk.bf16.vlgmr.msra.gmra.mrb[40].mxu0 %vm835_vm2, %v1292_v41  ;;  %v1266_v46 = vpop.xlane.xlu0 %1265 }
 0x30a   :  { %2267 = vmatpush3.bf16.msra.mxu0 %v1405_v38  ;;  %2379 = vrcp.f32 %v1266_v46  ;;  %2268 = vmatprep.mubr.msk.bf16.mxu0 %vm2412_vm0, %v2411_v1  ;;  %v1783_v38 = vsel %vm1311_vm3, %v2029_v37, 0 }
 0x30b   :  { %v1269_v57 = vpop.xlane.xlu1 %1268  ;;  %v1293_v39 = vpack.c.bf16 %v1285_v45, %v1285_v45  ;;  %2278 = vmatprep.subr.bf16.mxu0 %v2411_v1 }
 0x30c   :  { %v2376_v47 = vpop.eup %2375  ;;  %2381 = vrcp.f32 %v1269_v57 }
 0x30d   :  { %v1286_v49 = vmul.f32 %v2376_v47, %v2360_v10  ;;  %2263 = vmatmul.mubr.msk.bf16.vlgmr.msra.gmra.mrb[40].mxu1 %vm835_vm2, %v1293_v39  ;;  %v1307_v10 = vpack.c.bf16 %v816_v63, %v816_v63 }
 0x30e   :  { %2273 = vmatpush3.bf16.msra.mxu1 %v1451_v42  ;;  %2274 = vmatprep.mubr.msk.bf16.mxu1 %vm2412_vm0, %v2411_v1 }
 0x30f   :  { %v1294_v51 = vpack.c.bf16 %v1286_v49, %v1286_v49  ;;  %2284 = vmatprep.subr.bf16.mxu1 %v2411_v1  ;;  %v1635_v12 = vsel %vm1311_vm3, %v1307_v10, 0 }
 0x310   :  { %v2378_v52 = vpop.eup %2377 }
 0x311   :  { %v1287_v56 = vmul.f32 %v2378_v52, %v2713_v15  ;;  %2269 = vmatmul.mubr.msk.bf16.vlgmr.msra.gmra.mrb[44].mxu0 %vm835_vm2, %v1294_v51  ;;  %v1272_v58 = vpop.xlane.xlu0 %1271 }
 0x312   :  { %2279 = vmatpush3.bf16.msra.mxu0 %v1497_v54  ;;  %2383 = vrcp.f32 %v1272_v58  ;;  %2280 = vmatprep.mubr.msk.bf16.mxu0 %vm2412_vm0, %v2411_v1 }
 0x313   :  { %v1275_v59 = vpop.xlane.xlu1 %1274  ;;  %v1295_v61 = vpack.c.bf16 %v1287_v56, %v1287_v56  ;;  %2290 = vmatprep.subr.bf16.mxu0 %v2411_v1 }
 0x314   :  { %v2380_v0 = vpop.eup %2379  ;;  %2385 = vrcp.f32 %v1275_v59 }
 0x315   :  { %v1288_v5 = vmul.f32 %v2380_v0, %v2717_v20  ;;  %2275 = vmatmul.mubr.msk.bf16.vlgmr.msra.gmra.mrb[44].mxu1 %vm835_vm2, %v1295_v61  ;;  %v2026_v20 = vld [vmem:[%s2835_s3 + $0x4] sm:$0xf] }
 0x316   :  { %v2382_v6 = vpop.eup %2381  ;;  %2285 = vmatpush3.bf16.msra.mxu1 %v1543_v2  ;;  %2286 = vmatprep.mubr.msk.bf16.mxu1 %vm2412_vm0, %v2411_v1  ;;  %v1686_v21 = vsel %vm1311_vm3, %v2026_v20, 0 }
 0x317   :  { %v1289_v7 = vmul.f32 %v2382_v6, %v2721_v22  ;;  %v1296_v8 = vpack.c.bf16 %v1288_v5, %v1288_v5  ;;  %2296 = vmatprep.subr.bf16.mxu1 %v2411_v1 }
 0x319   :  { %2281 = vmatmul.mubr.msk.bf16.vlgmr.msra.gmra.mrb[48].mxu0 %vm835_vm2, %v1296_v8  ;;  %v1297_v3 = vpack.c.bf16 %v1289_v7, %v1289_v7 }
 0x31a   :  { %2291 = vmatpush3.bf16.msra.mxu0 %v1589_v9  ;;  %2292 = vmatprep.mubr.msk.bf16.mxu0 %vm2412_vm0, %v2411_v1 }
 0x31b   :  { %2302 = vmatprep.subr.bf16.mxu0 %v2411_v1 }
 0x31c   :  { %v2384_v11 = vpop.eup %2383 }
 0x31d   :  { %v1290_v13 = vmul.f32 %v2384_v11, %v2725_v24  ;;  %2287 = vmatmul.mubr.msk.bf16.vlgmr.msra.gmra.mrb[48].mxu1 %vm835_vm2, %v1297_v3 }
 0x31e   :  { %v2386_v14 = vpop.eup %2385  ;;  %2297 = vmatpush3.bf16.msra.mxu1 %v1635_v12  ;;  %2298 = vmatprep.mubr.msk.bf16.mxu1 %vm2412_vm0, %v2411_v1 }
 0x31f   :  { %v1298_v15 = vpack.c.bf16 %v1290_v13, %v1290_v13  ;;  %v1291_v16 = vmul.f32 %v2386_v14, %v2729_v26  ;;  %2308 = vmatprep.subr.bf16.mxu1 %v2411_v1 }
 0x321   :  { %2293 = vmatmul.mubr.msk.bf16.vlgmr.msra.gmra.mrb[52].mxu0 %vm835_vm2, %v1298_v15  ;;  %v1299_v17 = vpack.c.bf16 %v1291_v16, %v1291_v16  ;;  %v2033_v15 = vld [vmem:[%s2836_s4] ss:$0 sm:$0xff] }
 0x322   :  { %2304 = vmatprep.mubr.msk.bf16.mxu0 %vm2412_vm0, %v2411_v1  ;;  %2303 = vmatpush3.bf16.msra.mxu0 %v1686_v21 }
 0x323   :  { %2314 = vmatprep.subr.bf16.mxu0 %v2411_v1 }
 0x325   :  { %2299 = vmatmul.mubr.msk.bf16.vlgmr.msra.gmra.mrb[52].mxu1 %vm835_vm2, %v1299_v17 }
 0x326   :  { %2310 = vmatprep.mubr.msk.bf16.mxu1 %vm2412_vm0, %v2411_v1  ;;  %2309 = vmatpush3.bf16.msra.mxu1 %v1733_v19 }
 0x327   :  { %2320 = vmatprep.subr.bf16.mxu1 %v2411_v1 }
 0x3dc   :  { %v1349_v22 = vpop.f32.mrb[40].mxu0 }
 0x3dd   :  { %v2258_v23 = vpop.f32.mrb[41].mxu0 }
 0x3de   :  { %v1352_v24 = vpop.f32.mrb[42].mxu0 }
 0x3df   :  { %v2259_v26 = vpop.f32.mrb[43].mxu0 }
 0x3e0   :  { %v1395_v27 = vpop.f32.mrb[40].mxu1 }
 0x3e1   :  { %v1677_v28 = vpack.c.bf16 %v1395_v27, %v1349_v22  ;;  %v2264_v29 = vpop.f32.mrb[41].mxu1 }
 0x3e2   :  { %v1398_v31 = vpop.f32.mrb[42].mxu1 }
 0x3e3   :  { %v2265_v32 = vpop.f32.mrb[43].mxu1  ;;  %2311 = vmatmul.mubr.msk.bf16.vlgmr.msra.gmra.mrb[56].mxu1 %vm835_vm2, %v1677_v28 }
 0x3e4   :  { %v1441_v33 = vpop.f32.mrb[44].mxu0  ;;  %2321 = vmatpush3.bf16.msra.mxu1 %v1835_v30  ;;  %2322 = vmatprep.mubr.msk.bf16.mxu1 %vm2412_vm0, %v2411_v1 }
 0x3e5   :  { %v2270_v34 = vpop.f32.mrb[45].mxu0 }
 0x3e6   :  { %v1444_v35 = vpop.f32.mrb[46].mxu0 }
 0x3e7   :  { %v2271_v40 = vpop.f32.mrb[47].mxu0 }
 0x3e8   :  { %v1487_v36 = vpop.f32.mrb[44].mxu1 }
 0x3e9   :  { %v1679_v41 = vpack.c.bf16 %v1487_v36, %v1441_v33  ;;  %v2276_v43 = vpop.f32.mrb[45].mxu1 }
 0x3ea   :  { %v1490_v44 = vpop.f32.mrb[46].mxu1 }
 0x3eb   :  { %v2277_v53 = vpop.f32.mrb[47].mxu1  ;;  %2305 = vmatmul.mubr.msk.bf16.vlgmr.msra.gmra.mrb[56].mxu0 %vm835_vm2, %v1679_v41 }
 0x3ec   :  { %v1533_v45 = vpop.f32.mrb[48].mxu0  ;;  %2315 = vmatpush3.bf16.msra.mxu0 %v1783_v38  ;;  %2316 = vmatprep.mubr.msk.bf16.mxu0 %vm2412_vm0, %v2411_v1 }
 0x3ed   :  { %v2282_v46 = vpop.f32.mrb[49].mxu0 }
 0x3ee   :  { %v1536_v57 = vpop.f32.mrb[50].mxu0 }
 0x3ef   :  { %v2283_v39 = vpop.f32.mrb[51].mxu0 }
 0x3f0   :  { %v1579_v47 = vpop.f32.mrb[48].mxu1 }
 0x3f1   :  { %v1776_v42 = vpack.c.bf16 %v1579_v47, %v1533_v45  ;;  %v2288_v48 = vpop.f32.mrb[49].mxu1 }
 0x3f2   :  { %v1582_v60 = vpop.f32.mrb[50].mxu1 }
 0x3f3   :  { %v2289_v49 = vpop.f32.mrb[51].mxu1  ;;  %2317 = vmatmul.mubr.msk.bf16.vlgmr.msra.gmra.mrb[60].mxu0 %vm835_vm2, %v1776_v42 }
 0x3f4   :  { %v1625_v50 = vpop.f32.mrb[52].mxu0 }
 0x3f5   :  { %v2294_v51 = vpop.f32.mrb[53].mxu0 }
 0x3f6   :  { %v1628_v52 = vpop.f32.mrb[54].mxu0 }
 0x3f7   :  { %v2295_v54 = vpop.f32.mrb[55].mxu0 }
 0x3f8   :  { %v1671_v55 = vpop.f32.mrb[52].mxu1 }
 0x3f9   :  { %v1828_v62 = vpack.c.bf16 %v1671_v55, %v1625_v50  ;;  %v2300_v56 = vpop.f32.mrb[53].mxu1 }
 0x3fa   :  { %v1674_v58 = vpop.f32.mrb[54].mxu1 }
 0x3fb   :  { %v2301_v59 = vpop.f32.mrb[55].mxu1  ;;  %2323 = vmatmul.mubr.msk.bf16.vlgmr.msra.gmra.mrb[60].mxu1 %vm835_vm2, %v1828_v62 }
 0x4b6   :  { %v1769_v1 = vpop.f32.mrb[56].mxu1 }
 0x4b7   :  { %v2312_v61 = vpop.f32.mrb[57].mxu1 }
 0x4b8   :  { %v1772_v0 = vpop.f32.mrb[58].mxu1 }
 0x4b9   :  { %v2313_v2 = vpop.f32.mrb[59].mxu1 }
 0x4be   :  { %v1722_v4 = vpop.f32.mrb[56].mxu0 }
 0x4bf   :  { %v1770_v63 = vadd.f32 %v1769_v1, %v1722_v4  ;;  %v2306_v5 = vpop.f32.mrb[57].mxu0 }
 0x4c0   :  { %v1725_v6 = vpop.f32.mrb[58].mxu0 }
 0x4c1   :  { %v1773_v7 = vadd.f32 %v1772_v0, %v1725_v6  ;;  %v2307_v8 = vpop.f32.mrb[59].mxu0 }
 0x4c6   :  { %v1819_v9 = vpop.f32.mrb[60].mxu0 }
 0x4c7   :  { %v1826_v10 = vadd.f32 %v1819_v9, %v1770_v63  ;;  %v2318_v3 = vpop.f32.mrb[61].mxu0 }
 0x4c8   :  { %v1822_v11 = vpop.f32.mrb[62].mxu0 }
 0x4c9   :  { %v1827_v12 = vadd.f32 %v1822_v11, %v1773_v7  ;;  %v2319_v13 = vpop.f32.mrb[63].mxu0 }
 0x4ce   :  { %v1871_v14 = vpop.f32.mrb[60].mxu1 }
 0x4cf   :  { %v1878_v16 = vadd.f32 %v1871_v14, %v1826_v10  ;;  %v2324_v17 = vpop.f32.mrb[61].mxu1 }
 0x4d0   :  { %v1874_v18 = vpop.f32.mrb[62].mxu1 }
 0x4d1   :  { %v1887_v19 = vadd.f32 %v2033_v15, %v1878_v16  ;;  %v1879_v20 = vadd.f32 %v1874_v18, %v1827_v12  ;;  %v2325_v21 = vpop.f32.mrb[63].mxu1 }
 0x4d3   :  { %1889 = vst.msk [vmem:[#allocation2] sm:$0xff] %vm48_vm1, %v1887_v19  ;;  %v1888_v22 = vadd.f32 %v2033_v15, %v1879_v20 }
 0x4d5   :  { %1890 = vst.msk [vmem:[#allocation2 + $0x8] sm:$0xff] %vm48_vm1, %v1888_v22 }
 0x4d6   :  { %2398 = shalt.err (!%p2395_p4)
}
 0x4d7   :  { %s2399_s26 = scalar_lea.hbm %s2837_s5, 256 }
 0x4d8   :  { %p2400_p5 = scmp.ne.s32.totalorder %s2837_s5, %s2399_s26  ;;  %p2403_p6 = scmp.lt.u32.totalorder %s2399_s26, %s2837_s5 }
 0x4da   :  { %p2405_p7 = pnand %p2403_p6, %p2400_p5 }
 0x4dc   :  { %2408 = shalt.err (!%p2405_p7)
}
 0x4dd   :  { %s2414_s6 = smov 128   ;;  %s2415_s0 = smov 8  }
 0x4de   :  { %1902 = dma.vmem_to_hbm [thread:$0]  %s1897_s23, 256, %s2837_s5, [#allocation3], %s2414_s6, %s2414_s6, %s2415_s0  }
 0x4df   :  { %2409 = dma.done.wait [#allocation3], 256  }
 0x4e0   :  { %2410 = vsyncadd [#allocation3], 4294967040 }
 0x4e1   :  { %1906 = vsyncpa [#allocation3], 1 }

</bundles_post_ra>
